<compile_context>
chip_gen: v7x
topology: tpu7x:2x2x1
jax: 0.10.0
libtpu: 0.0.40
codegen_flags: <defaults>
</compile_context>

<pallas_src>
import jax
import jax.numpy as jnp
import numpy as np
from jax.experimental import pallas as pl
from jax.experimental.pallas import tpu as pltpu

SLOWFAST_ALPHA = 4

# Max HBM->HBM copies kept in flight (semaphore ring depth).  Deep enough to
# hide per-DMA issue latency on v6e/v7x; v5e saturates earlier anyway.
_DMA_RING = 8

# Fallback thresholds: below these, XLA's fused gather beats a kernel launch.
_MIN_ROW_RUN_BYTES = 512          # contiguous bytes per row per DMA window
_MIN_TOTAL_BYTES = 256 * 1024     # total read+write traffic of the gather


def _slow_indices(T: int, n_slow: int):
    # torch.linspace(0, T-1, n_slow).long(): float32 linspace, truncation.
    # Keep this in float32 to match PyTorch exactly (do NOT "upgrade" to f64).
    vals = np.linspace(0.0, float(T - 1), n_slow, dtype=np.float32)
    return [int(v) for v in vals.astype(np.int32)]


def _make_gather_kernel(idx, hw, ring):
    """Straight-line direct HBM->HBM DMA schedule for the temporal gather.

    One DMA per selected slow frame: copies the (n_rows, hw) window at
    temporal position idx[j] of the input to slot j of the output.  Up to
    `ring` copies are in flight; a copy only waits when its semaphore slot
    is about to be reused.
    """
    n_work = len(idx)
    assert n_work >= 1 and ring >= 1

    def kernel(x_ref, o_ref, sems):
        cps = [None] * n_work
        for j, src_t in enumerate(idx):
            if j >= ring:
                cps[j - ring].wait()            # recycle ring slot j % ring
            cp = pltpu.make_async_copy(
                x_ref.at[:, pl.ds(src_t * hw, hw)],
                o_ref.at[:, pl.ds(j * hw, hw)],
                sems.at[j % ring],
            )
            cp.start()
            cps[j] = cp
        # Drain the tail of the ring.
        for j in range(max(0, n_work - ring), n_work):
            cps[j].wait()

    return kernel


def _use_pallas(B, C, T, H, W, dtype) -> bool:
    n_slow = T // SLOWFAST_ALPHA
    if n_slow == 0:
        return False
    itemsize = np.dtype(dtype).itemsize
    hw = H * W
    total_bytes = 2 * B * C * n_slow * hw * itemsize   # read + write
    return (hw * itemsize >= _MIN_ROW_RUN_BYTES
            and total_bytes >= _MIN_TOTAL_BYTES)


def _pack_pathway_impl(frames):
    """frames: (B, C, T, H, W). Returns [slow_pathway, fast_pathway]."""
    B, C, T, H, W = frames.shape
    n_slow = T // SLOWFAST_ALPHA

    # Fast pathway is the unmodified input tensor (identity in PyTorch).
    fast = frames
    if n_slow == 0:
        return [frames[:, :, :0], fast]

    idx = _slow_indices(T, n_slow)

    if not _use_pallas(B, C, T, H, W, frames.dtype):
        # Tiny-input fallback: XLA fused gather is faster than a kernel launch.
        slow = jnp.take(frames, jnp.asarray(idx, dtype=jnp.int32), axis=2)
        return [slow, fast]

    n_rows = B * C
    hw = H * W
    itemsize = np.dtype(frames.dtype).itemsize
    ring = max(1, min(_DMA_RING, n_slow))

    # Free, row-major collapse: lane-dense (rows, T*H*W) layout for the DMAs.
    x2d = frames.reshape(n_rows, T * hw)

    kernel = _make_gather_kernel(idx, hw, ring)

    slow2d = pl.pallas_call(
        kernel,
        out_shape=jax.ShapeDtypeStruct((n_rows, n_slow * hw), frames.dtype),
        in_specs=[pl.BlockSpec(memory_space=pl.ANY)],
        out_specs=pl.BlockSpec(memory_space=pl.ANY),
        scratch_shapes=[pltpu.SemaphoreType.DMA((ring,))],
        cost_estimate=pl.CostEstimate(
            flops=0,
            transcendentals=0,
            bytes_accessed=2 * n_rows * n_slow * hw * itemsize,
        ),
    )(x2d)

    slow = slow2d.reshape(B, C, n_slow, H, W)
    return [slow, fast]


pack_pathway = jax.jit(_pack_pathway_impl)


if __name__ == "__main__":
    key = jax.random.PRNGKey(0)

    # --- Kernel path: shape large enough to pass the pallas threshold. ---
    B, C, T, H, W = 2, 3, 16, 64, 64      # ~1.5 MiB input, T divisible by 4
    assert _use_pallas(B, C, T, H, W, jnp.float32)
    frames = jax.random.normal(key, (B, C, T, H, W), dtype=jnp.float32)

    slow, fast = pack_pathway(frames)
    jax.block_until_ready(slow)
    jax.block_until_ready(fast)

    n_slow = T // SLOWFAST_ALPHA
    ref_idx = jnp.asarray(_slow_indices(T, n_slow), dtype=jnp.int32)
    slow_ref = jnp.take(frames, ref_idx, axis=2)

    assert slow.shape == (B, C, n_slow, H, W)
    assert fast.shape == frames.shape
    np.testing.assert_allclose(np.asarray(slow), np.asarray(slow_ref))
    np.testing.assert_allclose(np.asarray(fast), np.asarray(frames))

    # --- Tiny-input fallback path (jnp.take): correctness only. ---
    B2, C2, T2, H2, W2 = 2, 3, 8, 16, 16
    frames_small = jax.random.normal(
        jax.random.PRNGKey(1), (B2, C2, T2, H2, W2), dtype=jnp.float32)
    slow_s, fast_s = pack_pathway(frames_small)
    jax.block_until_ready(slow_s)
    n_slow_s = T2 // SLOWFAST_ALPHA
    ref_idx_s = jnp.asarray(_slow_indices(T2, n_slow_s), dtype=jnp.int32)
    np.testing.assert_allclose(
        np.asarray(slow_s), np.asarray(jnp.take(frames_small, ref_idx_s, axis=2)))
    np.testing.assert_allclose(np.asarray(fast_s), np.asarray(frames_small))

    print("KERNEL_OK")
</pallas_src>

<mosaic_0001>
module attributes {stable_mosaic.version = 11 : i64} {
  func.func @kernel(%arg0: memref<6x65536xf32, #tpu.memory_space<any>>, %arg1: memref<6x16384xf32, #tpu.memory_space<any>>, %arg2: memref<4x!tpu.dma_semaphore, #tpu.memory_space<semaphore_mem>>) attributes {dimension_semantics = [], scalar_prefetch = 0 : i64, scratch_operands = 1 : i64, tpu.core_type = #tpu.core_type<tc>} {
    %c0_i32 = arith.constant 0 : i32
    %c0_i32_0 = arith.constant 0 : i32
    %c0_i32_1 = arith.constant 0 : i32
    %0 = tpu.memref_slice %arg0[%c0_i32_0, %c0_i32_1] : memref<6x65536xf32, #tpu.memory_space<any>> -> memref<6x4096xf32, #tpu.memory_space<any>>
    %c0_i32_2 = arith.constant 0 : i32
    %c0_i32_3 = arith.constant 0 : i32
    %1 = tpu.memref_slice %arg1[%c0_i32_2, %c0_i32_3] : memref<6x16384xf32, #tpu.memory_space<any>> -> memref<6x4096xf32, #tpu.memory_space<any>>
    %2 = tpu.memref_slice %arg2[%c0_i32] : memref<4x!tpu.dma_semaphore, #tpu.memory_space<semaphore_mem>> -> memref<1x!tpu.dma_semaphore, #tpu.memory_space<semaphore_mem>>
    %3 = tpu.memref_squeeze %2 : memref<1x!tpu.dma_semaphore, #tpu.memory_space<semaphore_mem>> -> memref<!tpu.dma_semaphore, #tpu.memory_space<semaphore_mem>>
    tpu.enqueue_dma source(%0 : memref<6x4096xf32, #tpu.memory_space<any>>) target(%1 : memref<6x4096xf32, #tpu.memory_space<any>>) target_semaphore(%3 : memref<!tpu.dma_semaphore, #tpu.memory_space<semaphore_mem>>)
    %c1_i32 = arith.constant 1 : i32
    %c0_i32_4 = arith.constant 0 : i32
    %c20480_i32 = arith.constant 20480 : i32
    %4 = tpu.memref_slice %arg0[%c0_i32_4, %c20480_i32] : memref<6x65536xf32, #tpu.memory_space<any>> -> memref<6x4096xf32, #tpu.memory_space<any>>
    %c0_i32_5 = arith.constant 0 : i32
    %c4096_i32 = arith.constant 4096 : i32
    %5 = tpu.memref_slice %arg1[%c0_i32_5, %c4096_i32] : memref<6x16384xf32, #tpu.memory_space<any>> -> memref<6x4096xf32, #tpu.memory_space<any>>
    %6 = tpu.memref_slice %arg2[%c1_i32] : memref<4x!tpu.dma_semaphore, #tpu.memory_space<semaphore_mem>> -> memref<1x!tpu.dma_semaphore, #tpu.memory_space<semaphore_mem>>
    %7 = tpu.memref_squeeze %6 : memref<1x!tpu.dma_semaphore, #tpu.memory_space<semaphore_mem>> -> memref<!tpu.dma_semaphore, #tpu.memory_space<semaphore_mem>>
    tpu.enqueue_dma source(%4 : memref<6x4096xf32, #tpu.memory_space<any>>) target(%5 : memref<6x4096xf32, #tpu.memory_space<any>>) target_semaphore(%7 : memref<!tpu.dma_semaphore, #tpu.memory_space<semaphore_mem>>)
    %c2_i32 = arith.constant 2 : i32
    %c0_i32_6 = arith.constant 0 : i32
    %c40960_i32 = arith.constant 40960 : i32
    %8 = tpu.memref_slice %arg0[%c0_i32_6, %c40960_i32] : memref<6x65536xf32, #tpu.memory_space<any>> -> memref<6x4096xf32, #tpu.memory_space<any>>
    %c0_i32_7 = arith.constant 0 : i32
    %c8192_i32 = arith.constant 8192 : i32
    %9 = tpu.memref_slice %arg1[%c0_i32_7, %c8192_i32] : memref<6x16384xf32, #tpu.memory_space<any>> -> memref<6x4096xf32, #tpu.memory_space<any>>
    %10 = tpu.memref_slice %arg2[%c2_i32] : memref<4x!tpu.dma_semaphore, #tpu.memory_space<semaphore_mem>> -> memref<1x!tpu.dma_semaphore, #tpu.memory_space<semaphore_mem>>
    %11 = tpu.memref_squeeze %10 : memref<1x!tpu.dma_semaphore, #tpu.memory_space<semaphore_mem>> -> memref<!tpu.dma_semaphore, #tpu.memory_space<semaphore_mem>>
    tpu.enqueue_dma source(%8 : memref<6x4096xf32, #tpu.memory_space<any>>) target(%9 : memref<6x4096xf32, #tpu.memory_space<any>>) target_semaphore(%11 : memref<!tpu.dma_semaphore, #tpu.memory_space<semaphore_mem>>)
    %c3_i32 = arith.constant 3 : i32
    %c0_i32_8 = arith.constant 0 : i32
    %c61440_i32 = arith.constant 61440 : i32
    %12 = tpu.memref_slice %arg0[%c0_i32_8, %c61440_i32] : memref<6x65536xf32, #tpu.memory_space<any>> -> memref<6x4096xf32, #tpu.memory_space<any>>
    %c0_i32_9 = arith.constant 0 : i32
    %c12288_i32 = arith.constant 12288 : i32
    %13 = tpu.memref_slice %arg1[%c0_i32_9, %c12288_i32] : memref<6x16384xf32, #tpu.memory_space<any>> -> memref<6x4096xf32, #tpu.memory_space<any>>
    %14 = tpu.memref_slice %arg2[%c3_i32] : memref<4x!tpu.dma_semaphore, #tpu.memory_space<semaphore_mem>> -> memref<1x!tpu.dma_semaphore, #tpu.memory_space<semaphore_mem>>
    %15 = tpu.memref_squeeze %14 : memref<1x!tpu.dma_semaphore, #tpu.memory_space<semaphore_mem>> -> memref<!tpu.dma_semaphore, #tpu.memory_space<semaphore_mem>>
    tpu.enqueue_dma source(%12 : memref<6x4096xf32, #tpu.memory_space<any>>) target(%13 : memref<6x4096xf32, #tpu.memory_space<any>>) target_semaphore(%15 : memref<!tpu.dma_semaphore, #tpu.memory_space<semaphore_mem>>)
    %c0_i32_10 = arith.constant 0 : i32
    %c0_i32_11 = arith.constant 0 : i32
    %c0_i32_12 = arith.constant 0 : i32
    %16 = tpu.memref_slice %arg0[%c0_i32_11, %c0_i32_12] : memref<6x65536xf32, #tpu.memory_space<any>> -> memref<6x4096xf32, #tpu.memory_space<any>>
    %c0_i32_13 = arith.constant 0 : i32
    %c0_i32_14 = arith.constant 0 : i32
    %17 = tpu.memref_slice %arg1[%c0_i32_13, %c0_i32_14] : memref<6x16384xf32, #tpu.memory_space<any>> -> memref<6x4096xf32, #tpu.memory_space<any>>
    %18 = tpu.memref_slice %arg2[%c0_i32_10] : memref<4x!tpu.dma_semaphore, #tpu.memory_space<semaphore_mem>> -> memref<1x!tpu.dma_semaphore, #tpu.memory_space<semaphore_mem>>
    %19 = tpu.memref_squeeze %18 : memref<1x!tpu.dma_semaphore, #tpu.memory_space<semaphore_mem>> -> memref<!tpu.dma_semaphore, #tpu.memory_space<semaphore_mem>>
    tpu.wait_dma2 semaphore(%19 : memref<!tpu.dma_semaphore, #tpu.memory_space<semaphore_mem>>) src(%16 : memref<6x4096xf32, #tpu.memory_space<any>>) dst(%17 : memref<6x4096xf32, #tpu.memory_space<any>>)
    %c1_i32_15 = arith.constant 1 : i32
    %c0_i32_16 = arith.constant 0 : i32
    %c20480_i32_17 = arith.constant 20480 : i32
    %20 = tpu.memref_slice %arg0[%c0_i32_16, %c20480_i32_17] : memref<6x65536xf32, #tpu.memory_space<any>> -> memref<6x4096xf32, #tpu.memory_space<any>>
    %c0_i32_18 = arith.constant 0 : i32
    %c4096_i32_19 = arith.constant 4096 : i32
    %21 = tpu.memref_slice %arg1[%c0_i32_18, %c4096_i32_19] : memref<6x16384xf32, #tpu.memory_space<any>> -> memref<6x4096xf32, #tpu.memory_space<any>>
    %22 = tpu.memref_slice %arg2[%c1_i32_15] : memref<4x!tpu.dma_semaphore, #tpu.memory_space<semaphore_mem>> -> memref<1x!tpu.dma_semaphore, #tpu.memory_space<semaphore_mem>>
    %23 = tpu.memref_squeeze %22 : memref<1x!tpu.dma_semaphore, #tpu.memory_space<semaphore_mem>> -> memref<!tpu.dma_semaphore, #tpu.memory_space<semaphore_mem>>
    tpu.wait_dma2 semaphore(%23 : memref<!tpu.dma_semaphore, #tpu.memory_space<semaphore_mem>>) src(%20 : memref<6x4096xf32, #tpu.memory_space<any>>) dst(%21 : memref<6x4096xf32, #tpu.memory_space<any>>)
    %c2_i32_20 = arith.constant 2 : i32
    %c0_i32_21 = arith.constant 0 : i32
    %c40960_i32_22 = arith.constant 40960 : i32
    %24 = tpu.memref_slice %arg0[%c0_i32_21, %c40960_i32_22] : memref<6x65536xf32, #tpu.memory_space<any>> -> memref<6x4096xf32, #tpu.memory_space<any>>
    %c0_i32_23 = arith.constant 0 : i32
    %c8192_i32_24 = arith.constant 8192 : i32
    %25 = tpu.memref_slice %arg1[%c0_i32_23, %c8192_i32_24] : memref<6x16384xf32, #tpu.memory_space<any>> -> memref<6x4096xf32, #tpu.memory_space<any>>
    %26 = tpu.memref_slice %arg2[%c2_i32_20] : memref<4x!tpu.dma_semaphore, #tpu.memory_space<semaphore_mem>> -> memref<1x!tpu.dma_semaphore, #tpu.memory_space<semaphore_mem>>
    %27 = tpu.memref_squeeze %26 : memref<1x!tpu.dma_semaphore, #tpu.memory_space<semaphore_mem>> -> memref<!tpu.dma_semaphore, #tpu.memory_space<semaphore_mem>>
    tpu.wait_dma2 semaphore(%27 : memref<!tpu.dma_semaphore, #tpu.memory_space<semaphore_mem>>) src(%24 : memref<6x4096xf32, #tpu.memory_space<any>>) dst(%25 : memref<6x4096xf32, #tpu.memory_space<any>>)
    %c3_i32_25 = arith.constant 3 : i32
    %c0_i32_26 = arith.constant 0 : i32
    %c61440_i32_27 = arith.constant 61440 : i32
    %28 = tpu.memref_slice %arg0[%c0_i32_26, %c61440_i32_27] : memref<6x65536xf32, #tpu.memory_space<any>> -> memref<6x4096xf32, #tpu.memory_space<any>>
    %c0_i32_28 = arith.constant 0 : i32
    %c12288_i32_29 = arith.constant 12288 : i32
    %29 = tpu.memref_slice %arg1[%c0_i32_28, %c12288_i32_29] : memref<6x16384xf32, #tpu.memory_space<any>> -> memref<6x4096xf32, #tpu.memory_space<any>>
    %30 = tpu.memref_slice %arg2[%c3_i32_25] : memref<4x!tpu.dma_semaphore, #tpu.memory_space<semaphore_mem>> -> memref<1x!tpu.dma_semaphore, #tpu.memory_space<semaphore_mem>>
    %31 = tpu.memref_squeeze %30 : memref<1x!tpu.dma_semaphore, #tpu.memory_space<semaphore_mem>> -> memref<!tpu.dma_semaphore, #tpu.memory_space<semaphore_mem>>
    tpu.wait_dma2 semaphore(%31 : memref<!tpu.dma_semaphore, #tpu.memory_space<semaphore_mem>>) src(%28 : memref<6x4096xf32, #tpu.memory_space<any>>) dst(%29 : memref<6x4096xf32, #tpu.memory_space<any>>)
    return
  }
}

</mosaic_0001>

<bundles_post_ra>
// kernel: _pack_pathway_impl.1
= control target key start
LH: loop header
LB: loop body
LE: loop exit
PB: predicated region body
PF: predicated region fallthrough
CT: control target
= control target key end

     0   :  { %s1488_s0 = inlined_call_operand.vmem [shape: f32[6,65536], index: 0, kind: input, shape index: {}]   ;;  %s1489_s1 = inlined_call_operand.vmem [shape: f32[6,16384], index: 1, kind: output, shape index: {}]  }
   0x1   :  { %v38_v0 = vld [vmem:[%s1488_s0] sm:$0xff]  ;;  %v40_v1 = vld [vmem:[%s1488_s0 + $0x8] sm:$0xff]  ;;  %v42_v2 = vld [vmem:[%s1488_s0 + $0x10] sm:$0xff] }
   0x2   :  { %39 = vst [vmem:[%s1489_s1] sm:$0xff] %v38_v0  ;;  %41 = vst [vmem:[%s1489_s1 + $0x8] sm:$0xff] %v40_v1  ;;  %v44_v3 = vld [vmem:[%s1488_s0 + $0x18] sm:$0xff]  ;;  %v46_v4 = vld [vmem:[%s1488_s0 + $0x20] sm:$0xff] }
   0x3   :  { %43 = vst [vmem:[%s1489_s1 + $0x10] sm:$0xff] %v42_v2  ;;  %v48_v5 = vld [vmem:[%s1488_s0 + $0x28] sm:$0xff]  ;;  %45 = vst [vmem:[%s1489_s1 + $0x18] sm:$0xff] %v44_v3  ;;  %v50_v6 = vld [vmem:[%s1488_s0 + $0x30] sm:$0xff] }
   0x4   :  { %47 = vst [vmem:[%s1489_s1 + $0x20] sm:$0xff] %v46_v4  ;;  %49 = vst [vmem:[%s1489_s1 + $0x28] sm:$0xff] %v48_v5  ;;  %v52_v7 = vld [vmem:[%s1488_s0 + $0x38] sm:$0xff]  ;;  %v54_v8 = vld [vmem:[%s1488_s0 + $0x40] sm:$0xff] }
   0x5   :  { %51 = vst [vmem:[%s1489_s1 + $0x30] sm:$0xff] %v50_v6  ;;  %53 = vst [vmem:[%s1489_s1 + $0x38] sm:$0xff] %v52_v7  ;;  %v56_v9 = vld [vmem:[%s1488_s0 + $0x48] sm:$0xff]  ;;  %v58_v10 = vld [vmem:[%s1488_s0 + $0x50] sm:$0xff] }
   0x6   :  { %55 = vst [vmem:[%s1489_s1 + $0x40] sm:$0xff] %v54_v8  ;;  %v60_v11 = vld [vmem:[%s1488_s0 + $0x58] sm:$0xff]  ;;  %57 = vst [vmem:[%s1489_s1 + $0x48] sm:$0xff] %v56_v9  ;;  %v62_v12 = vld [vmem:[%s1488_s0 + $0x60] sm:$0xff] }
   0x7   :  { %59 = vst [vmem:[%s1489_s1 + $0x50] sm:$0xff] %v58_v10  ;;  %61 = vst [vmem:[%s1489_s1 + $0x58] sm:$0xff] %v60_v11  ;;  %v64_v13 = vld [vmem:[%s1488_s0 + $0x68] sm:$0xff]  ;;  %v66_v14 = vld [vmem:[%s1488_s0 + $0x70] sm:$0xff] }
   0x8   :  { %63 = vst [vmem:[%s1489_s1 + $0x60] sm:$0xff] %v62_v12  ;;  %65 = vst [vmem:[%s1489_s1 + $0x68] sm:$0xff] %v64_v13  ;;  %v68_v15 = vld [vmem:[%s1488_s0 + $0x78] sm:$0xff]  ;;  %v70_v16 = vld [vmem:[%s1488_s0 + $0x80] sm:$0xff] }
   0x9   :  { %67 = vst [vmem:[%s1489_s1 + $0x70] sm:$0xff] %v66_v14  ;;  %v72_v17 = vld [vmem:[%s1488_s0 + $0x88] sm:$0xff]  ;;  %69 = vst [vmem:[%s1489_s1 + $0x78] sm:$0xff] %v68_v15  ;;  %v74_v18 = vld [vmem:[%s1488_s0 + $0x90] sm:$0xff] }
   0xa   :  { %71 = vst [vmem:[%s1489_s1 + $0x80] sm:$0xff] %v70_v16  ;;  %73 = vst [vmem:[%s1489_s1 + $0x88] sm:$0xff] %v72_v17  ;;  %v76_v19 = vld [vmem:[%s1488_s0 + $0x98] sm:$0xff]  ;;  %v78_v20 = vld [vmem:[%s1488_s0 + $0xa0] sm:$0xff] }
   0xb   :  { %75 = vst [vmem:[%s1489_s1 + $0x90] sm:$0xff] %v74_v18  ;;  %77 = vst [vmem:[%s1489_s1 + $0x98] sm:$0xff] %v76_v19  ;;  %v80_v21 = vld [vmem:[%s1488_s0 + $0xa8] sm:$0xff]  ;;  %v82_v22 = vld [vmem:[%s1488_s0 + $0xb0] sm:$0xff] }
   0xc   :  { %79 = vst [vmem:[%s1489_s1 + $0xa0] sm:$0xff] %v78_v20  ;;  %v84_v23 = vld [vmem:[%s1488_s0 + $0xb8] sm:$0xff]  ;;  %81 = vst [vmem:[%s1489_s1 + $0xa8] sm:$0xff] %v80_v21  ;;  %v86_v24 = vld [vmem:[%s1488_s0 + $0xc0] sm:$0xff] }
   0xd   :  { %83 = vst [vmem:[%s1489_s1 + $0xb0] sm:$0xff] %v82_v22  ;;  %85 = vst [vmem:[%s1489_s1 + $0xb8] sm:$0xff] %v84_v23  ;;  %v88_v25 = vld [vmem:[%s1488_s0 + $0xc8] sm:$0xff]  ;;  %v90_v26 = vld [vmem:[%s1488_s0 + $0xd0] sm:$0xff] }
   0xe   :  { %87 = vst [vmem:[%s1489_s1 + $0xc0] sm:$0xff] %v86_v24  ;;  %89 = vst [vmem:[%s1489_s1 + $0xc8] sm:$0xff] %v88_v25  ;;  %v92_v27 = vld [vmem:[%s1488_s0 + $0xd8] sm:$0xff]  ;;  %v94_v28 = vld [vmem:[%s1488_s0 + $0xe0] sm:$0xff] }
   0xf   :  { %91 = vst [vmem:[%s1489_s1 + $0xd0] sm:$0xff] %v90_v26  ;;  %v96_v29 = vld [vmem:[%s1488_s0 + $0xe8] sm:$0xff]  ;;  %93 = vst [vmem:[%s1489_s1 + $0xd8] sm:$0xff] %v92_v27  ;;  %v98_v30 = vld [vmem:[%s1488_s0 + $0xf0] sm:$0xff] }
  0x10   :  { %95 = vst [vmem:[%s1489_s1 + $0xe0] sm:$0xff] %v94_v28  ;;  %97 = vst [vmem:[%s1489_s1 + $0xe8] sm:$0xff] %v96_v29  ;;  %v100_v31 = vld [vmem:[%s1488_s0 + $0xf8] sm:$0xff] }
  0x11   :  { %99 = vst [vmem:[%s1489_s1 + $0xf0] sm:$0xff] %v98_v30  ;;  %101 = vst [vmem:[%s1489_s1 + $0xf8] sm:$0xff] %v100_v31 }
  0x12   :  { %109 = vsyncadd [#allocation2], 4096  ;;  %v500_v32 = vld [vmem:[%s1488_s0 + $0x500] sm:$0xff]  ;;  %v502_v33 = vld [vmem:[%s1488_s0 + $0x508] sm:$0xff] }
  0x13   :  { %501 = vst [vmem:[%s1489_s1 + $0x100] sm:$0xff] %v500_v32  ;;  %503 = vst [vmem:[%s1489_s1 + $0x108] sm:$0xff] %v502_v33  ;;  %v504_v34 = vld [vmem:[%s1488_s0 + $0x510] sm:$0xff]  ;;  %v506_v35 = vld [vmem:[%s1488_s0 + $0x518] sm:$0xff] }
  0x14   :  { %v508_v36 = vld [vmem:[%s1488_s0 + $0x520] sm:$0xff]  ;;  %505 = vst [vmem:[%s1489_s1 + $0x110] sm:$0xff] %v504_v34  ;;  %507 = vst [vmem:[%s1489_s1 + $0x118] sm:$0xff] %v506_v35  ;;  %v510_v37 = vld [vmem:[%s1488_s0 + $0x528] sm:$0xff] }
  0x15   :  { %509 = vst [vmem:[%s1489_s1 + $0x120] sm:$0xff] %v508_v36  ;;  %v512_v38 = vld [vmem:[%s1488_s0 + $0x530] sm:$0xff]  ;;  %v514_v39 = vld [vmem:[%s1488_s0 + $0x538] sm:$0xff]  ;;  %511 = vst [vmem:[%s1489_s1 + $0x128] sm:$0xff] %v510_v37 }
  0x16   :  { %513 = vst [vmem:[%s1489_s1 + $0x130] sm:$0xff] %v512_v38  ;;  %515 = vst [vmem:[%s1489_s1 + $0x138] sm:$0xff] %v514_v39  ;;  %v516_v40 = vld [vmem:[%s1488_s0 + $0x540] sm:$0xff]  ;;  %v518_v41 = vld [vmem:[%s1488_s0 + $0x548] sm:$0xff] }
  0x17   :  { %v520_v42 = vld [vmem:[%s1488_s0 + $0x550] sm:$0xff]  ;;  %517 = vst [vmem:[%s1489_s1 + $0x140] sm:$0xff] %v516_v40  ;;  %519 = vst [vmem:[%s1489_s1 + $0x148] sm:$0xff] %v518_v41  ;;  %v522_v43 = vld [vmem:[%s1488_s0 + $0x558] sm:$0xff] }
  0x18   :  { %521 = vst [vmem:[%s1489_s1 + $0x150] sm:$0xff] %v520_v42  ;;  %v524_v44 = vld [vmem:[%s1488_s0 + $0x560] sm:$0xff]  ;;  %v526_v45 = vld [vmem:[%s1488_s0 + $0x568] sm:$0xff]  ;;  %523 = vst [vmem:[%s1489_s1 + $0x158] sm:$0xff] %v522_v43 }
  0x19   :  { %525 = vst [vmem:[%s1489_s1 + $0x160] sm:$0xff] %v524_v44  ;;  %527 = vst [vmem:[%s1489_s1 + $0x168] sm:$0xff] %v526_v45  ;;  %v528_v46 = vld [vmem:[%s1488_s0 + $0x570] sm:$0xff]  ;;  %v530_v47 = vld [vmem:[%s1488_s0 + $0x578] sm:$0xff] }
  0x1a   :  { %v532_v48 = vld [vmem:[%s1488_s0 + $0x580] sm:$0xff]  ;;  %529 = vst [vmem:[%s1489_s1 + $0x170] sm:$0xff] %v528_v46  ;;  %531 = vst [vmem:[%s1489_s1 + $0x178] sm:$0xff] %v530_v47  ;;  %v534_v49 = vld [vmem:[%s1488_s0 + $0x588] sm:$0xff] }
  0x1b   :  { %533 = vst [vmem:[%s1489_s1 + $0x180] sm:$0xff] %v532_v48  ;;  %v536_v50 = vld [vmem:[%s1488_s0 + $0x590] sm:$0xff]  ;;  %v538_v51 = vld [vmem:[%s1488_s0 + $0x598] sm:$0xff]  ;;  %535 = vst [vmem:[%s1489_s1 + $0x188] sm:$0xff] %v534_v49 }
  0x1c   :  { %537 = vst [vmem:[%s1489_s1 + $0x190] sm:$0xff] %v536_v50  ;;  %539 = vst [vmem:[%s1489_s1 + $0x198] sm:$0xff] %v538_v51  ;;  %v540_v52 = vld [vmem:[%s1488_s0 + $0x5a0] sm:$0xff]  ;;  %v542_v53 = vld [vmem:[%s1488_s0 + $0x5a8] sm:$0xff] }
  0x1d   :  { %v544_v54 = vld [vmem:[%s1488_s0 + $0x5b0] sm:$0xff]  ;;  %541 = vst [vmem:[%s1489_s1 + $0x1a0] sm:$0xff] %v540_v52  ;;  %543 = vst [vmem:[%s1489_s1 + $0x1a8] sm:$0xff] %v542_v53  ;;  %v546_v55 = vld [vmem:[%s1488_s0 + $0x5b8] sm:$0xff] }
  0x1e   :  { %545 = vst [vmem:[%s1489_s1 + $0x1b0] sm:$0xff] %v544_v54  ;;  %v548_v56 = vld [vmem:[%s1488_s0 + $0x5c0] sm:$0xff]  ;;  %v550_v57 = vld [vmem:[%s1488_s0 + $0x5c8] sm:$0xff]  ;;  %547 = vst [vmem:[%s1489_s1 + $0x1b8] sm:$0xff] %v546_v55 }
  0x1f   :  { %549 = vst [vmem:[%s1489_s1 + $0x1c0] sm:$0xff] %v548_v56  ;;  %551 = vst [vmem:[%s1489_s1 + $0x1c8] sm:$0xff] %v550_v57  ;;  %v552_v58 = vld [vmem:[%s1488_s0 + $0x5d0] sm:$0xff]  ;;  %v554_v59 = vld [vmem:[%s1488_s0 + $0x5d8] sm:$0xff] }
  0x20   :  { %v556_v60 = vld [vmem:[%s1488_s0 + $0x5e0] sm:$0xff]  ;;  %553 = vst [vmem:[%s1489_s1 + $0x1d0] sm:$0xff] %v552_v58  ;;  %555 = vst [vmem:[%s1489_s1 + $0x1d8] sm:$0xff] %v554_v59  ;;  %v558_v61 = vld [vmem:[%s1488_s0 + $0x5e8] sm:$0xff] }
  0x21   :  { %557 = vst [vmem:[%s1489_s1 + $0x1e0] sm:$0xff] %v556_v60  ;;  %v560_v62 = vld [vmem:[%s1488_s0 + $0x5f0] sm:$0xff]  ;;  %v562_v63 = vld [vmem:[%s1488_s0 + $0x5f8] sm:$0xff]  ;;  %559 = vst [vmem:[%s1489_s1 + $0x1e8] sm:$0xff] %v558_v61 }
  0x22   :  { %561 = vst [vmem:[%s1489_s1 + $0x1f0] sm:$0xff] %v560_v62  ;;  %563 = vst [vmem:[%s1489_s1 + $0x1f8] sm:$0xff] %v562_v63 }
  0x23   :  { %216 = vsyncadd [#allocation2 + $0x1], 4096  ;;  %v566_v0 = vld [vmem:[%s1488_s0 + $0xa00] sm:$0xff]  ;;  %v568_v1 = vld [vmem:[%s1488_s0 + $0xa08] sm:$0xff] }
  0x24   :  { %567 = vst [vmem:[%s1489_s1 + $0x200] sm:$0xff] %v566_v0  ;;  %569 = vst [vmem:[%s1489_s1 + $0x208] sm:$0xff] %v568_v1  ;;  %v570_v2 = vld [vmem:[%s1488_s0 + $0xa10] sm:$0xff]  ;;  %v572_v3 = vld [vmem:[%s1488_s0 + $0xa18] sm:$0xff] }
  0x25   :  { %v574_v4 = vld [vmem:[%s1488_s0 + $0xa20] sm:$0xff]  ;;  %571 = vst [vmem:[%s1489_s1 + $0x210] sm:$0xff] %v570_v2  ;;  %573 = vst [vmem:[%s1489_s1 + $0x218] sm:$0xff] %v572_v3  ;;  %v576_v5 = vld [vmem:[%s1488_s0 + $0xa28] sm:$0xff] }
  0x26   :  { %575 = vst [vmem:[%s1489_s1 + $0x220] sm:$0xff] %v574_v4  ;;  %v578_v6 = vld [vmem:[%s1488_s0 + $0xa30] sm:$0xff]  ;;  %v580_v7 = vld [vmem:[%s1488_s0 + $0xa38] sm:$0xff]  ;;  %577 = vst [vmem:[%s1489_s1 + $0x228] sm:$0xff] %v576_v5 }
  0x27   :  { %579 = vst [vmem:[%s1489_s1 + $0x230] sm:$0xff] %v578_v6  ;;  %581 = vst [vmem:[%s1489_s1 + $0x238] sm:$0xff] %v580_v7  ;;  %v582_v8 = vld [vmem:[%s1488_s0 + $0xa40] sm:$0xff]  ;;  %v584_v9 = vld [vmem:[%s1488_s0 + $0xa48] sm:$0xff] }
  0x28   :  { %v586_v10 = vld [vmem:[%s1488_s0 + $0xa50] sm:$0xff]  ;;  %583 = vst [vmem:[%s1489_s1 + $0x240] sm:$0xff] %v582_v8  ;;  %585 = vst [vmem:[%s1489_s1 + $0x248] sm:$0xff] %v584_v9  ;;  %v588_v11 = vld [vmem:[%s1488_s0 + $0xa58] sm:$0xff] }
  0x29   :  { %587 = vst [vmem:[%s1489_s1 + $0x250] sm:$0xff] %v586_v10  ;;  %v590_v12 = vld [vmem:[%s1488_s0 + $0xa60] sm:$0xff]  ;;  %v592_v13 = vld [vmem:[%s1488_s0 + $0xa68] sm:$0xff]  ;;  %589 = vst [vmem:[%s1489_s1 + $0x258] sm:$0xff] %v588_v11 }
  0x2a   :  { %591 = vst [vmem:[%s1489_s1 + $0x260] sm:$0xff] %v590_v12  ;;  %593 = vst [vmem:[%s1489_s1 + $0x268] sm:$0xff] %v592_v13  ;;  %v594_v14 = vld [vmem:[%s1488_s0 + $0xa70] sm:$0xff]  ;;  %v596_v15 = vld [vmem:[%s1488_s0 + $0xa78] sm:$0xff] }
  0x2b   :  { %v598_v16 = vld [vmem:[%s1488_s0 + $0xa80] sm:$0xff]  ;;  %595 = vst [vmem:[%s1489_s1 + $0x270] sm:$0xff] %v594_v14  ;;  %597 = vst [vmem:[%s1489_s1 + $0x278] sm:$0xff] %v596_v15  ;;  %v600_v17 = vld [vmem:[%s1488_s0 + $0xa88] sm:$0xff] }
  0x2c   :  { %599 = vst [vmem:[%s1489_s1 + $0x280] sm:$0xff] %v598_v16  ;;  %v602_v18 = vld [vmem:[%s1488_s0 + $0xa90] sm:$0xff]  ;;  %v604_v19 = vld [vmem:[%s1488_s0 + $0xa98] sm:$0xff]  ;;  %601 = vst [vmem:[%s1489_s1 + $0x288] sm:$0xff] %v600_v17 }
  0x2d   :  { %603 = vst [vmem:[%s1489_s1 + $0x290] sm:$0xff] %v602_v18  ;;  %605 = vst [vmem:[%s1489_s1 + $0x298] sm:$0xff] %v604_v19  ;;  %v606_v20 = vld [vmem:[%s1488_s0 + $0xaa0] sm:$0xff]  ;;  %v608_v21 = vld [vmem:[%s1488_s0 + $0xaa8] sm:$0xff] }
  0x2e   :  { %v610_v22 = vld [vmem:[%s1488_s0 + $0xab0] sm:$0xff]  ;;  %607 = vst [vmem:[%s1489_s1 + $0x2a0] sm:$0xff] %v606_v20  ;;  %609 = vst [vmem:[%s1489_s1 + $0x2a8] sm:$0xff] %v608_v21  ;;  %v612_v23 = vld [vmem:[%s1488_s0 + $0xab8] sm:$0xff] }
  0x2f   :  { %611 = vst [vmem:[%s1489_s1 + $0x2b0] sm:$0xff] %v610_v22  ;;  %v614_v24 = vld [vmem:[%s1488_s0 + $0xac0] sm:$0xff]  ;;  %v616_v25 = vld [vmem:[%s1488_s0 + $0xac8] sm:$0xff]  ;;  %613 = vst [vmem:[%s1489_s1 + $0x2b8] sm:$0xff] %v612_v23 }
  0x30   :  { %615 = vst [vmem:[%s1489_s1 + $0x2c0] sm:$0xff] %v614_v24  ;;  %617 = vst [vmem:[%s1489_s1 + $0x2c8] sm:$0xff] %v616_v25  ;;  %v618_v26 = vld [vmem:[%s1488_s0 + $0xad0] sm:$0xff]  ;;  %v620_v27 = vld [vmem:[%s1488_s0 + $0xad8] sm:$0xff] }
  0x31   :  { %v622_v28 = vld [vmem:[%s1488_s0 + $0xae0] sm:$0xff]  ;;  %619 = vst [vmem:[%s1489_s1 + $0x2d0] sm:$0xff] %v618_v26  ;;  %621 = vst [vmem:[%s1489_s1 + $0x2d8] sm:$0xff] %v620_v27  ;;  %v624_v29 = vld [vmem:[%s1488_s0 + $0xae8] sm:$0xff] }
  0x32   :  { %623 = vst [vmem:[%s1489_s1 + $0x2e0] sm:$0xff] %v622_v28  ;;  %v626_v30 = vld [vmem:[%s1488_s0 + $0xaf0] sm:$0xff]  ;;  %v628_v31 = vld [vmem:[%s1488_s0 + $0xaf8] sm:$0xff]  ;;  %625 = vst [vmem:[%s1489_s1 + $0x2e8] sm:$0xff] %v624_v29 }
  0x33   :  { %627 = vst [vmem:[%s1489_s1 + $0x2f0] sm:$0xff] %v626_v30  ;;  %629 = vst [vmem:[%s1489_s1 + $0x2f8] sm:$0xff] %v628_v31 }
  0x34   :  { %323 = vsyncadd [#allocation2 + $0x2], 4096  ;;  %v632_v32 = vld [vmem:[%s1488_s0 + $0xf00] sm:$0xff]  ;;  %v634_v33 = vld [vmem:[%s1488_s0 + $0xf08] sm:$0xff] }
  0x35   :  { %633 = vst [vmem:[%s1489_s1 + $0x300] sm:$0xff] %v632_v32  ;;  %635 = vst [vmem:[%s1489_s1 + $0x308] sm:$0xff] %v634_v33  ;;  %v636_v34 = vld [vmem:[%s1488_s0 + $0xf10] sm:$0xff]  ;;  %v638_v35 = vld [vmem:[%s1488_s0 + $0xf18] sm:$0xff] }
  0x36   :  { %v640_v36 = vld [vmem:[%s1488_s0 + $0xf20] sm:$0xff]  ;;  %637 = vst [vmem:[%s1489_s1 + $0x310] sm:$0xff] %v636_v34  ;;  %639 = vst [vmem:[%s1489_s1 + $0x318] sm:$0xff] %v638_v35  ;;  %v642_v37 = vld [vmem:[%s1488_s0 + $0xf28] sm:$0xff] }
  0x37   :  { %641 = vst [vmem:[%s1489_s1 + $0x320] sm:$0xff] %v640_v36  ;;  %v644_v38 = vld [vmem:[%s1488_s0 + $0xf30] sm:$0xff]  ;;  %v646_v39 = vld [vmem:[%s1488_s0 + $0xf38] sm:$0xff]  ;;  %643 = vst [vmem:[%s1489_s1 + $0x328] sm:$0xff] %v642_v37 }
  0x38   :  { %645 = vst [vmem:[%s1489_s1 + $0x330] sm:$0xff] %v644_v38  ;;  %647 = vst [vmem:[%s1489_s1 + $0x338] sm:$0xff] %v646_v39  ;;  %v648_v40 = vld [vmem:[%s1488_s0 + $0xf40] sm:$0xff]  ;;  %v650_v41 = vld [vmem:[%s1488_s0 + $0xf48] sm:$0xff] }
  0x39   :  { %v652_v42 = vld [vmem:[%s1488_s0 + $0xf50] sm:$0xff]  ;;  %649 = vst [vmem:[%s1489_s1 + $0x340] sm:$0xff] %v648_v40  ;;  %651 = vst [vmem:[%s1489_s1 + $0x348] sm:$0xff] %v650_v41  ;;  %v654_v43 = vld [vmem:[%s1488_s0 + $0xf58] sm:$0xff] }
  0x3a   :  { %653 = vst [vmem:[%s1489_s1 + $0x350] sm:$0xff] %v652_v42  ;;  %v656_v44 = vld [vmem:[%s1488_s0 + $0xf60] sm:$0xff]  ;;  %v658_v45 = vld [vmem:[%s1488_s0 + $0xf68] sm:$0xff]  ;;  %655 = vst [vmem:[%s1489_s1 + $0x358] sm:$0xff] %v654_v43 }
  0x3b   :  { %657 = vst [vmem:[%s1489_s1 + $0x360] sm:$0xff] %v656_v44  ;;  %659 = vst [vmem:[%s1489_s1 + $0x368] sm:$0xff] %v658_v45  ;;  %v660_v46 = vld [vmem:[%s1488_s0 + $0xf70] sm:$0xff]  ;;  %v662_v47 = vld [vmem:[%s1488_s0 + $0xf78] sm:$0xff] }
  0x3c   :  { %v664_v48 = vld [vmem:[%s1488_s0 + $0xf80] sm:$0xff]  ;;  %661 = vst [vmem:[%s1489_s1 + $0x370] sm:$0xff] %v660_v46  ;;  %663 = vst [vmem:[%s1489_s1 + $0x378] sm:$0xff] %v662_v47  ;;  %v666_v49 = vld [vmem:[%s1488_s0 + $0xf88] sm:$0xff] }
  0x3d   :  { %665 = vst [vmem:[%s1489_s1 + $0x380] sm:$0xff] %v664_v48  ;;  %v668_v50 = vld [vmem:[%s1488_s0 + $0xf90] sm:$0xff]  ;;  %v670_v51 = vld [vmem:[%s1488_s0 + $0xf98] sm:$0xff]  ;;  %667 = vst [vmem:[%s1489_s1 + $0x388] sm:$0xff] %v666_v49 }
  0x3e   :  { %669 = vst [vmem:[%s1489_s1 + $0x390] sm:$0xff] %v668_v50  ;;  %671 = vst [vmem:[%s1489_s1 + $0x398] sm:$0xff] %v670_v51  ;;  %v672_v52 = vld [vmem:[%s1488_s0 + $0xfa0] sm:$0xff]  ;;  %v674_v53 = vld [vmem:[%s1488_s0 + $0xfa8] sm:$0xff] }
  0x3f   :  { %v676_v54 = vld [vmem:[%s1488_s0 + $0xfb0] sm:$0xff]  ;;  %673 = vst [vmem:[%s1489_s1 + $0x3a0] sm:$0xff] %v672_v52  ;;  %675 = vst [vmem:[%s1489_s1 + $0x3a8] sm:$0xff] %v674_v53  ;;  %v678_v55 = vld [vmem:[%s1488_s0 + $0xfb8] sm:$0xff] }
  0x40   :  { %677 = vst [vmem:[%s1489_s1 + $0x3b0] sm:$0xff] %v676_v54  ;;  %v680_v56 = vld [vmem:[%s1488_s0 + $0xfc0] sm:$0xff]  ;;  %v682_v57 = vld [vmem:[%s1488_s0 + $0xfc8] sm:$0xff]  ;;  %679 = vst [vmem:[%s1489_s1 + $0x3b8] sm:$0xff] %v678_v55 }
  0x41   :  { %681 = vst [vmem:[%s1489_s1 + $0x3c0] sm:$0xff] %v680_v56  ;;  %683 = vst [vmem:[%s1489_s1 + $0x3c8] sm:$0xff] %v682_v57  ;;  %v684_v58 = vld [vmem:[%s1488_s0 + $0xfd0] sm:$0xff]  ;;  %v686_v59 = vld [vmem:[%s1488_s0 + $0xfd8] sm:$0xff] }
  0x42   :  { %v688_v60 = vld [vmem:[%s1488_s0 + $0xfe0] sm:$0xff]  ;;  %685 = vst [vmem:[%s1489_s1 + $0x3d0] sm:$0xff] %v684_v58  ;;  %687 = vst [vmem:[%s1489_s1 + $0x3d8] sm:$0xff] %v686_v59  ;;  %v690_v61 = vld [vmem:[%s1488_s0 + $0xfe8] sm:$0xff] }
  0x43   :  { %689 = vst [vmem:[%s1489_s1 + $0x3e0] sm:$0xff] %v688_v60  ;;  %v692_v62 = vld [vmem:[%s1488_s0 + $0xff0] sm:$0xff]  ;;  %v694_v63 = vld [vmem:[%s1488_s0 + $0xff8] sm:$0xff]  ;;  %691 = vst [vmem:[%s1489_s1 + $0x3e8] sm:$0xff] %v690_v61 }
  0x44   :  { %693 = vst [vmem:[%s1489_s1 + $0x3f0] sm:$0xff] %v692_v62  ;;  %695 = vst [vmem:[%s1489_s1 + $0x3f8] sm:$0xff] %v694_v63 }
  0x45   :  { %430 = vsyncadd [#allocation2 + $0x3], 4096 }
  0x46   :  { %702 = dma.done.wait [#allocation2], 4096 }
  0x47   :  { %703 = vsyncadd [#allocation2], 4294963200 }
  0x48   :  { %704 = dma.done.wait [#allocation2 + $0x1], 4096 }
  0x49   :  { %705 = vsyncadd [#allocation2 + $0x1], 4294963200 }
  0x4a   :  { %706 = dma.done.wait [#allocation2 + $0x2], 4096 }
  0x4b   :  { %707 = vsyncadd [#allocation2 + $0x2], 4294963200 }
  0x4c   :  { %708 = dma.done.wait [#allocation2 + $0x3], 4096 }
  0x4d   :  { %709 = vsyncadd [#allocation2 + $0x3], 4294963200 }
  0x4e   :  { %441 = vsyncmov [#allocation2] }
  0x51   :  { %s442_s0 = vpop.sfrf %441 }
  0x52   :  { %p698_p0 = scmp.ne.s32.totalorder %s442_s0, 0 }
  0x54   :  { %446 = shalt.err (%p698_p0)  }
  0x55   :  { %448 = vsyncmov [#allocation2 + $0x1] }
  0x58   :  { %s449_s25 = vpop.sfrf %448 }
  0x59   :  { %p699_p1 = scmp.ne.s32.totalorder %s449_s25, 0 }
  0x5b   :  { %453 = shalt.err (%p699_p1)  }
  0x5c   :  { %455 = vsyncmov [#allocation2 + $0x2] }
  0x5f   :  { %s456_s26 = vpop.sfrf %455 }
  0x60   :  { %p700_p2 = scmp.ne.s32.totalorder %s456_s26, 0 }
  0x62   :  { %460 = shalt.err (%p700_p2)  }
  0x63   :  { %462 = vsyncmov [#allocation2 + $0x3] }
  0x66   :  { %s463_s1 = vpop.sfrf %462 }
  0x67   :  { %p701_p3 = scmp.ne.s32.totalorder %s463_s1, 0 }
  0x69   :  { %467 = shalt.err (%p701_p3)  }

</bundles_post_ra>
